<compile_context>
chip_gen: v6e
topology: v6e:2x2x1
jax: 0.10.0
libtpu: 0.0.40
codegen_flags: <defaults>
</compile_context>

<pallas_src>
import jax
import jax.numpy as jnp
from jax.experimental import pallas as pl
from jax.experimental.pallas import tpu as pltpu

FACE_LOSS_WEIGHT = 0.1
CLIP_LOSS_WEIGHT = 1.0
DELTA_LOSS_WEIGHT = 0.8


def _styleclip_cos_kernel(img_ref, w_ref, text_ref, out_ref, acc_ref):
    # img_ref:  (M, tk)   bf16  rows 0..B-1 = new images, row B = base image
    # w_ref:    (tk, 2E)  bf16  contiguous K-tile of fused [face | clip] weights
    # text_ref: (1, E)    f32   target-text embedding
    # out_ref:  (1, 128)  f32   weighted cosine-loss partial (lane-replicated)
    # acc_ref:  (M, 2E)   f32   embedding accumulator (VMEM scratch)
    k = pl.program_id(0)

    @pl.when(k == 0)
    def _():
        acc_ref[...] = jnp.zeros_like(acc_ref)

    acc_ref[...] += jnp.dot(img_ref[...], w_ref[...],
                            preferred_element_type=jnp.float32)

    @pl.when(k == pl.num_programs(0) - 1)
    def _():
        acc = acc_ref[...]                       # (M, 2E) f32 embeddings
        m, two_e = acc.shape
        b = m - 1
        e = two_e // 2

        face_emb = acc[:b, :e]                   # (B, E) new-image face emb
        clip_emb = acc[:b, e:]                   # (B, E) new-image clip emb
        base_face = acc[b:b + 1, :e]             # (1, E) base-image face emb
        text = text_ref[...]                     # (1, E) target-text emb

        eps = jnp.float32(1e-8)

        def mean_one_minus_cos(a, r):
            num = jnp.sum(a * r, axis=-1, keepdims=True)        # (B, 1)
            na = jnp.sum(a * a, axis=-1, keepdims=True)         # (B, 1)
            nr = jnp.sum(r * r, axis=-1, keepdims=True)         # (1, 1)
            den = jnp.sqrt(na) * jnp.sqrt(nr) + eps
            per = 1.0 - num / den                               # (B, 1)
            return jnp.sum(per, axis=(0, 1), keepdims=True) * jnp.float32(1.0 / b)

        face_loss = mean_one_minus_cos(face_emb, base_face)     # (1, 1)
        clip_loss = mean_one_minus_cos(clip_emb, text)          # (1, 1)
        total = (jnp.float32(FACE_LOSS_WEIGHT) * face_loss
                 + jnp.float32(CLIP_LOSS_WEIGHT) * clip_loss)
        out_ref[...] = jnp.broadcast_to(total, out_ref.shape)


def _round_up(x, m):
    return ((x + m - 1) // m) * m


def plan_k_tiling(d_in, batch, emb_dim, *, tk_max=16384,
                  vmem_budget_bytes=40 << 20):
    """VMEM-aware K-tile planning.

    Picks tk as a multiple of 128 such that the double-buffered bf16 weight
    (tk, 2E) + image (M, tk) tiles plus residents fit the budget (conservative
    for v7x's 64 MiB per-TC VMEM), then pads Din up to a multiple of tk so
    there is never a whole-reduction fallback tile.
    """
    m = batch + 1
    resident = m * 2 * emb_dim * 4 + 2 * emb_dim * 4 + 2 * 128 * 4  # acc + text + out
    per_k_row = 2 * (2 * emb_dim * 2 + m * 2)   # dbl-buffered bf16 weight + image bytes
    tk_budget = max(128, ((vmem_budget_bytes - resident) // per_k_row) // 128 * 128)
    tk = min(tk_budget, tk_max, _round_up(d_in, 128))
    tk = max(128, (tk // 128) * 128)
    d_in_pad = _round_up(d_in, tk)
    return tk, d_in_pad


def prepare_encoder_weights(w_face, w_clip, d_in_pad):
    """One-time (construction-time) weight prep, hoisted out of the loss call.

    Fuses the two encoder projections along N into a (Din_pad, 2E) bf16
    operand so every K-tile DMA in the kernel is fully contiguous.
    """
    w = jnp.concatenate([w_face, w_clip], axis=1).astype(jnp.bfloat16)
    pad = d_in_pad - w.shape[0]
    if pad:
        w = jnp.pad(w, ((0, pad), (0, 0)))
    return w


def solo_styleclip_loss(new_img, new_w, base_img, base_w, w_fused, text_emb,
                        *, tk, d_in_pad):
    """Forward pass of SoloStyleClipLoss.

    new_img:  (B, C, H, W)  float32 NCHW
    new_w:    (B, L, Dw)
    base_img: (1, C, H, W)
    base_w:   (B, L, Dw)
    w_fused:  (Din_pad, 2E) bf16, from prepare_encoder_weights()
    text_emb: (1, E)
    """
    B = new_img.shape[0]
    d_in = new_img.shape[1] * new_img.shape[2] * new_img.shape[3]
    E = text_emb.shape[-1]
    M = B + 1
    nk = d_in_pad // tk

    # Fold base_img in as row B: its face embedding falls out of the same
    # streamed matmul (no second pass over the face weights per call).
    img_all = jnp.concatenate(
        [new_img.reshape(B, d_in), base_img.reshape(1, d_in)], axis=0)
    if d_in_pad > d_in:
        img_all = jnp.pad(img_all, ((0, 0), (0, d_in_pad - d_in)))
    img_all = img_all.astype(jnp.bfloat16)                       # (M, Din_pad)

    text = text_emb.astype(jnp.float32).reshape(1, E)

    cost = pl.CostEstimate(
        flops=2 * M * d_in_pad * 2 * E,
        transcendentals=4,
        bytes_accessed=(w_fused.size * 2 + img_all.size * 2
                        + text.size * 4 + 128 * 4),
    )

    cos_out = pl.pallas_call(
        _styleclip_cos_kernel,
        out_shape=jax.ShapeDtypeStruct((1, 128), jnp.float32),
        grid_spec=pltpu.PrefetchScalarGridSpec(
            num_scalar_prefetch=0,
            grid=(nk,),
            in_specs=[
                pl.BlockSpec((M, tk), lambda k: (0, k)),         # images (K-tiled)
                pl.BlockSpec((tk, 2 * E), lambda k: (k, 0)),     # fused weights (contiguous)
                pl.BlockSpec((1, E), lambda k: (0, 0)),          # text embedding (resident)
            ],
            out_specs=pl.BlockSpec((1, 128), lambda k: (0, 0)),
            scratch_shapes=[pltpu.VMEM((M, 2 * E), jnp.float32)],
        ),
        compiler_params=pltpu.CompilerParams(
            dimension_semantics=("arbitrary",),
            vmem_limit_bytes=48 * 1024 * 1024,
        ),
        cost_estimate=cost,
    )(img_all, w_fused, text)

    # Delta MSE stays in plain JAX: tiny elementwise reduction, overlaps with
    # the kernel and keeps two resident VMEM inputs out of the pipeline.
    delta_loss = jnp.mean(jnp.square(new_w.astype(jnp.float32)
                                     - base_w.astype(jnp.float32)))
    return cos_out[0, 0] + jnp.float32(DELTA_LOSS_WEIGHT) * delta_loss


def _reference_loss(new_img, new_w, base_img, base_w, w_face, w_clip, text_emb):
    """Pure-JAX reference mirroring the kernel numerics (bf16 matmul, f32 accum)."""
    B = new_img.shape[0]
    d_in = new_img.shape[1] * new_img.shape[2] * new_img.shape[3]
    img = new_img.reshape(B, d_in).astype(jnp.bfloat16)
    base = base_img.reshape(1, d_in).astype(jnp.bfloat16)
    wf = w_face.astype(jnp.bfloat16)
    wc = w_clip.astype(jnp.bfloat16)
    f_emb = jnp.dot(img, wf, preferred_element_type=jnp.float32)
    c_emb = jnp.dot(img, wc, preferred_element_type=jnp.float32)
    fb = jnp.dot(base, wf, preferred_element_type=jnp.float32)

    def omc(a, r):
        num = jnp.sum(a * r, axis=-1)
        den = jnp.linalg.norm(a, axis=-1) * jnp.linalg.norm(r, axis=-1) + 1e-8
        return 1.0 - num / den

    face_loss = jnp.mean(omc(f_emb, fb))
    clip_loss = jnp.mean(omc(c_emb, text_emb.astype(jnp.float32)))
    delta_loss = jnp.mean((new_w - base_w) ** 2)
    return (face_loss * FACE_LOSS_WEIGHT + clip_loss * CLIP_LOSS_WEIGHT
            + delta_loss * DELTA_LOSS_WEIGHT)


if __name__ == "__main__":
    key = jax.random.PRNGKey(0)
    k1, k2, k3, k4, k5, k6, k7 = jax.random.split(key, 7)

    B, C, H, W = 2, 3, 16, 16     # new_img
    L, DW = 8, 32                 # latent w: (B, L, DW)
    E = 128                       # embedding dim
    D_IN = C * H * W              # 768

    new_img = jax.random.normal(k1, (B, C, H, W), dtype=jnp.float32)
    base_img = jax.random.normal(k2, (1, C, H, W), dtype=jnp.float32)
    new_w = jax.random.normal(k3, (B, L, DW), dtype=jnp.float32)
    base_w = jax.random.normal(k4, (B, L, DW), dtype=jnp.float32)

    # Deterministic synthetic "model" parameters.
    w_face = jax.random.normal(k5, (D_IN, E), dtype=jnp.float32) * 0.02
    w_clip = jax.random.normal(k6, (D_IN, E), dtype=jnp.float32) * 0.02
    text_emb = jax.random.normal(k7, (1, E), dtype=jnp.float32)

    # tk_max=256 forces a 3-step K grid at these toy sizes (exercises the
    # accumulator / pipelining path); at real sizes leave the default tk_max
    # (multi-MB weight tiles, sized for the 64 MiB v7x VMEM budget).
    tk, d_in_pad = plan_k_tiling(D_IN, B, E, tk_max=256)

    # One-time weight prep (construction-time in the PyTorch module).
    w_fused = jax.block_until_ready(prepare_encoder_weights(w_face, w_clip, d_in_pad))

    loss = solo_styleclip_loss(new_img, new_w, base_img, base_w,
                               w_fused, text_emb, tk=tk, d_in_pad=d_in_pad)
    loss = jax.block_until_ready(loss)

    ref = _reference_loss(new_img, new_w, base_img, base_w,
                          w_face, w_clip, text_emb)
    assert jnp.allclose(loss, ref, rtol=1e-3, atol=1e-3), (loss, ref)

    print("KERNEL_OK")
</pallas_src>

<mosaic_0001>
module attributes {stable_mosaic.version = 11 : i64} {
  func.func @_styleclip_cos_kernel(%arg0: i32, %arg1: memref<3x256xbf16, #tpu.memory_space<vmem>>, %arg2: memref<256x256xbf16, #tpu.memory_space<vmem>>, %arg3: memref<1x128xf32, #tpu.memory_space<vmem>>, %arg4: memref<1x128xf32, #tpu.memory_space<vmem>>, %arg5: memref<3x256xf32, #tpu.memory_space<vmem>>) attributes {dimension_semantics = [#tpu.dimension_semantics<arbitrary>], iteration_bounds = array<i64: 3>, scalar_prefetch = 0 : i64, scratch_operands = 1 : i64, tpu.core_type = #tpu.core_type<tc>, window_params = [{transform_indices = @transform_0, window_bounds = array<i64: 3, 256>}, {transform_indices = @transform_1, window_bounds = array<i64: 256, 256>}, {pipeline_mode = #tpu.pipeline_mode<synchronous>, transform_indices = @transform_2, window_bounds = array<i64: 1, 128>}, {pipeline_mode = #tpu.pipeline_mode<synchronous>, transform_indices = @transform_3, window_bounds = array<i64: 1, 128>}]} {
    %c0_i32 = arith.constant 0 : i32
    %0 = arith.cmpi eq, %arg0, %c0_i32 : i32
    %1 = arith.extui %0 : i1 to i32
    %c0_i32_0 = arith.constant 0 : i32
    %2 = arith.cmpi ne, %1, %c0_i32_0 : i32
    scf.if %2 {
      %cst_9 = arith.constant 0.000000e+00 : f32
      %12 = vector.broadcast %cst_9 : f32 to vector<3x256xf32>
      %c0_10 = arith.constant 0 : index
      %c0_11 = arith.constant 0 : index
      %13 = vector.load %arg5[%c0_10, %c0_11] : memref<3x256xf32, #tpu.memory_space<vmem>>, vector<3x256xf32>
      tpu.vector_store %arg5[%c0_10, %c0_11], %12 {strides = array<i32>} : memref<3x256xf32, #tpu.memory_space<vmem>>, vector<3x256xf32>,
    } else {
    }
    %c0 = arith.constant 0 : index
    %c0_1 = arith.constant 0 : index
    %3 = vector.load %arg5[%c0, %c0_1] : memref<3x256xf32, #tpu.memory_space<vmem>>, vector<3x256xf32>
    %c0_2 = arith.constant 0 : index
    %c0_3 = arith.constant 0 : index
    %4 = vector.load %arg1[%c0_2, %c0_3] : memref<3x256xbf16, #tpu.memory_space<vmem>>, vector<3x256xbf16>
    %c0_4 = arith.constant 0 : index
    %c0_5 = arith.constant 0 : index
    %5 = vector.load %arg2[%c0_4, %c0_5] : memref<256x256xbf16, #tpu.memory_space<vmem>>, vector<256x256xbf16>
    %cst = arith.constant dense<0.000000e+00> : vector<3x256xf32>
    %6 = tpu.matmul %4, %5, %cst {dimension_numbers = #tpu.dot_dimension_numbers<[1], [0], [0], [1], [0, 0, 1, 1], [], []>} : vector<3x256xbf16>, vector<256x256xbf16>, vector<3x256xf32> -> vector<3x256xf32>
    %7 = arith.addf %3, %6 : vector<3x256xf32>
    %c0_6 = arith.constant 0 : index
    %c0_7 = arith.constant 0 : index
    %8 = vector.load %arg5[%c0_6, %c0_7] : memref<3x256xf32, #tpu.memory_space<vmem>>, vector<3x256xf32>
    tpu.vector_store %arg5[%c0_6, %c0_7], %7 {strides = array<i32>} : memref<3x256xf32, #tpu.memory_space<vmem>>, vector<3x256xf32>,
    %c2_i32 = arith.constant 2 : i32
    %9 = arith.cmpi eq, %arg0, %c2_i32 : i32
    %10 = arith.extui %9 : i1 to i32
    %c0_i32_8 = arith.constant 0 : i32
    %11 = arith.cmpi ne, %10, %c0_i32_8 : i32
    scf.if %11 {
      %c0_9 = arith.constant 0 : index
      %c0_10 = arith.constant 0 : index
      %12 = vector.load %arg5[%c0_9, %c0_10] : memref<3x256xf32, #tpu.memory_space<vmem>>, vector<3x256xf32>
      %13 = vector.extract_strided_slice %12 {offsets = [0, 0], sizes = [2, 128], strides = [1, 1]} : vector<3x256xf32> to vector<2x128xf32>
      %14 = vector.extract_strided_slice %12 {offsets = [0, 128], sizes = [2, 128], strides = [1, 1]} : vector<3x256xf32> to vector<2x128xf32>
      %15 = vector.extract_strided_slice %12 {offsets = [2, 0], sizes = [1, 128], strides = [1, 1]} : vector<3x256xf32> to vector<1x128xf32>
      %c0_11 = arith.constant 0 : index
      %c0_12 = arith.constant 0 : index
      %16 = vector.load %arg3[%c0_11, %c0_12] : memref<1x128xf32, #tpu.memory_space<vmem>>, vector<1x128xf32>
      %17 = vector.broadcast %15 : vector<1x128xf32> to vector<2x128xf32>
      %18 = arith.mulf %13, %17 : vector<2x128xf32>
      %cst_13 = arith.constant dense<0.000000e+00> : vector<2xf32>
      %19 = vector.multi_reduction <add>, %18, %cst_13 [1] : vector<2x128xf32> to vector<2xf32>
      %20 = vector.shape_cast %19 : vector<2xf32> to vector<2x1xf32>
      %21 = arith.mulf %13, %13 : vector<2x128xf32>
      %cst_14 = arith.constant dense<0.000000e+00> : vector<2xf32>
      %22 = vector.multi_reduction <add>, %21, %cst_14 [1] : vector<2x128xf32> to vector<2xf32>
      %23 = vector.shape_cast %22 : vector<2xf32> to vector<2x1xf32>
      %24 = arith.mulf %15, %15 : vector<1x128xf32>
      %cst_15 = arith.constant dense<0.000000e+00> : vector<1xf32>
      %25 = vector.multi_reduction <add>, %24, %cst_15 [1] : vector<1x128xf32> to vector<1xf32>
      %26 = vector.shape_cast %25 : vector<1xf32> to vector<1x1xf32>
      %27 = math.sqrt %23 : vector<2x1xf32>
      %28 = math.sqrt %26 : vector<1x1xf32>
      %29 = vector.broadcast %28 : vector<1x1xf32> to vector<2x1xf32>
      %30 = arith.mulf %27, %29 : vector<2x1xf32>
      %cst_16 = arith.constant 9.99999993E-9 : f32
      %31 = vector.broadcast %cst_16 : f32 to vector<2x1xf32>
      %32 = arith.addf %30, %31 : vector<2x1xf32>
      %33 = arith.divf %20, %32 : vector<2x1xf32>
      %cst_17 = arith.constant 1.000000e+00 : f32
      %34 = vector.broadcast %cst_17 : f32 to vector<2x1xf32>
      %35 = arith.subf %34, %33 : vector<2x1xf32>
      %36 = vector.shape_cast %35 : vector<2x1xf32> to vector<1x2x1xf32>
      %cst_18 = arith.constant dense<0.000000e+00> : vector<1xf32>
      %37 = vector.multi_reduction <add>, %36, %cst_18 [1, 2] : vector<1x2x1xf32> to vector<1xf32>
      %38 = vector.shape_cast %37 : vector<1xf32> to vector<1x1x1xf32>
      %39 = vector.extract %38[0, 0, 0] : f32 from vector<1x1x1xf32>
      %40 = vector.broadcast %39 : f32 to vector<1x1xf32>
      %cst_19 = arith.constant 5.000000e-01 : f32
      %41 = vector.broadcast %cst_19 : f32 to vector<1x1xf32>
      %42 = arith.mulf %40, %41 : vector<1x1xf32>
      %43 = vector.broadcast %16 : vector<1x128xf32> to vector<2x128xf32>
      %44 = arith.mulf %14, %43 : vector<2x128xf32>
      %cst_20 = arith.constant dense<0.000000e+00> : vector<2xf32>
      %45 = vector.multi_reduction <add>, %44, %cst_20 [1] : vector<2x128xf32> to vector<2xf32>
      %46 = vector.shape_cast %45 : vector<2xf32> to vector<2x1xf32>
      %47 = arith.mulf %14, %14 : vector<2x128xf32>
      %cst_21 = arith.constant dense<0.000000e+00> : vector<2xf32>
      %48 = vector.multi_reduction <add>, %47, %cst_21 [1] : vector<2x128xf32> to vector<2xf32>
      %49 = vector.shape_cast %48 : vector<2xf32> to vector<2x1xf32>
      %50 = arith.mulf %16, %16 : vector<1x128xf32>
      %cst_22 = arith.constant dense<0.000000e+00> : vector<1xf32>
      %51 = vector.multi_reduction <add>, %50, %cst_22 [1] : vector<1x128xf32> to vector<1xf32>
      %52 = vector.shape_cast %51 : vector<1xf32> to vector<1x1xf32>
      %53 = math.sqrt %49 : vector<2x1xf32>
      %54 = math.sqrt %52 : vector<1x1xf32>
      %55 = vector.broadcast %54 : vector<1x1xf32> to vector<2x1xf32>
      %56 = arith.mulf %53, %55 : vector<2x1xf32>
      %cst_23 = arith.constant 9.99999993E-9 : f32
      %57 = vector.broadcast %cst_23 : f32 to vector<2x1xf32>
      %58 = arith.addf %56, %57 : vector<2x1xf32>
      %59 = arith.divf %46, %58 : vector<2x1xf32>
      %cst_24 = arith.constant 1.000000e+00 : f32
      %60 = vector.broadcast %cst_24 : f32 to vector<2x1xf32>
      %61 = arith.subf %60, %59 : vector<2x1xf32>
      %62 = vector.shape_cast %61 : vector<2x1xf32> to vector<1x2x1xf32>
      %cst_25 = arith.constant dense<0.000000e+00> : vector<1xf32>
      %63 = vector.multi_reduction <add>, %62, %cst_25 [1, 2] : vector<1x2x1xf32> to vector<1xf32>
      %64 = vector.shape_cast %63 : vector<1xf32> to vector<1x1x1xf32>
      %65 = vector.extract %64[0, 0, 0] : f32 from vector<1x1x1xf32>
      %66 = vector.broadcast %65 : f32 to vector<1x1xf32>
      %cst_26 = arith.constant 5.000000e-01 : f32
      %67 = vector.broadcast %cst_26 : f32 to vector<1x1xf32>
      %68 = arith.mulf %66, %67 : vector<1x1xf32>
      %cst_27 = arith.constant 1.000000e-01 : f32
      %69 = vector.broadcast %cst_27 : f32 to vector<1x1xf32>
      %70 = arith.mulf %69, %42 : vector<1x1xf32>
      %cst_28 = arith.constant 1.000000e+00 : f32
      %71 = vector.broadcast %cst_28 : f32 to vector<1x1xf32>
      %72 = arith.mulf %71, %68 : vector<1x1xf32>
      %73 = arith.addf %70, %72 : vector<1x1xf32>
      %74 = vector.shape_cast %73 : vector<1x1xf32> to vector<1x1xf32>
      %75 = vector.broadcast %74 : vector<1x1xf32> to vector<1x128xf32>
      %c0_29 = arith.constant 0 : index
      %c0_30 = arith.constant 0 : index
      %76 = vector.load %arg4[%c0_29, %c0_30] : memref<1x128xf32, #tpu.memory_space<vmem>>, vector<1x128xf32>
      tpu.vector_store %arg4[%c0_29, %c0_30], %75 {strides = array<i32>} : memref<1x128xf32, #tpu.memory_space<vmem>>, vector<1x128xf32>,
    } else {
    }
    return
  }
  func.func @transform_0(%arg0: i32) -> (i32, i32) {
    %c0_i32 = arith.constant 0 : i32
    %c0_i32_0 = arith.constant 0 : i32
    return %c0_i32, %arg0 : i32, i32
  }
  func.func @transform_1(%arg0: i32) -> (i32, i32) {
    %c0_i32 = arith.constant 0 : i32
    %c0_i32_0 = arith.constant 0 : i32
    return %arg0, %c0_i32 : i32, i32
  }
  func.func @transform_2(%arg0: i32) -> (i32, i32) {
    %c0_i32 = arith.constant 0 : i32
    %c0_i32_0 = arith.constant 0 : i32
    %c0_i32_1 = arith.constant 0 : i32
    return %c0_i32, %c0_i32_0 : i32, i32
  }
  func.func @transform_3(%arg0: i32) -> (i32, i32) {
    %c0_i32 = arith.constant 0 : i32
    %c0_i32_0 = arith.constant 0 : i32
    %c0_i32_1 = arith.constant 0 : i32
    return %c0_i32, %c0_i32_0 : i32, i32
  }
}

</mosaic_0001>

<bundles_post_ra>
// kernel: tpu_custom_call.1
= control target key start
LH: loop header
LB: loop body
LE: loop exit
PB: predicated region body
PF: predicated region fallthrough
CT: control target
= control target key end

     0   :  { %8 = vsyncpa [#allocation4], 0  ;;  %s1204_s0 = inlined_call_operand.hbm [shape: bf16[3,768], index: 0, kind: input, shape index: {}]   ;;  %s1205_s1 = inlined_call_operand.hbm [shape: bf16[768,256], index: 1, kind: input, shape index: {}]   ;;  %s1206_s2 = inlined_call_operand.vmem [shape: f32[1,128], index: 2, kind: input, shape index: {}]   ;;  %s1207_s3 = inlined_call_operand.hbm [shape: f32[1,128], index: 3, kind: output, shape index: {}]  }
   0x1   :  { %10 = vsyncpa [#allocation4 + $0x1], 0 }
   0x2   :  { %11 = vsyncpa [#allocation7], 0 }
   0x3   :  { %13 = vsyncpa [#allocation7 + $0x1], 0 }
   0x4   :  { %14 = vsyncpa [#allocation5], 0  ;;  %s997_s12 = smov 0   ;;  %s999_s13 = smov 0  }
   0x5   :  { %s1001_s14 = smov 0   ;;  %s1003_s15 = smov 0  }
   0x6 LB: > { %s1016_s16 = sadd.s32 4294967295, %s969_s15   ;;  %s1019_s17 = sadd.s32 1, %s969_s15   ;;  %s969_s15 = sphi %s1003_s15, %s1218_s15   ;;  %s965_s14 = sphi %s1001_s14, %s1217_s14   ;;  %s961_s13 = sphi %s999_s13, %s1216_s13   ;;  %s957_s12 = sphi %s997_s12, %s1215_s12  }
   0x7   : > { %s24_s18 = ssub.s32 %s969_s15, %s1019_s17  ;;  %s27_s19 = sadd.s32 1, %s965_s14 }
   0x8   : > { %p25_p0 = scmp.eq.s32.totalorder %s24_s18, 0  ;;  %p34_p1 = scmp.ne.s32.totalorder %s965_s14, %s961_s13 }
   0x9   : > { %p35_p2 = scmp.eq.s32.totalorder %s969_s15, 0  ;;  %p40_p3 = scmp.ne.s32.totalorder %s961_s13, %s957_s12 }
   0xa   : > { %s1029_s20 = scalar_select %p25_p0, %s965_s14, %s27_s19  }
   0xb   : > { %p36_p4 = por %p35_p2, %p34_p1  ;;  %p41_p5 = scmp.eq.s32.totalorder %s1016_s16, 0 }
   0xc   : > { %p748_p6 = scmp.lt.s32.totalorder %s969_s15, 3  ;;  %s1038_s22 = sand.u32 1, %s965_s14  }
   0xd   : > { %p1033_p7 = por %p41_p5, %p40_p3  ;;  %s677_s23 = sshll.u32 %s1038_s22, 2 }
   0xe   : > { %s726_s24 = sshll.u32 %s969_s15, 6  ;;  %s139_s28 = scalar_lea.vmem [#allocation3], %s677_s23 }
   0xf   : > { %s1209_s21 = scalar_select %p1033_p7, 1, 0 }
  0x10   : > { %s1045_s27 = scalar_lea.hbm %s1204_s0, %s726_s24  ;;  %s147_s29 = sshll.u32 %s139_s28, 4  ;;  %s1047_s29 = int_to_ptr.vmem [resolvable:$true] %s147_s29 }
  0x11   : > { %p1049_p8 = pnand %p748_p6, %p36_p4  ;;  %s136_s4 = scalar_lea.sflag [#allocation4], %s1038_s22 }
  0x12   : > { %s847_s5 = scalar_lea.hbm %s1045_s27, 64  ;;  %s852_s8 = scalar_lea.hbm %s1204_s0, 192 }
  0x13   : > { %p848_p11 = scmp.ne.s32.totalorder %s1045_s27, %s847_s5  ;;  %p849_p12 = pneg %p1049_p8 }
  0x14   : > { %p853_p1 = scmp.lt.s32.totalorder %s1045_s27, %s1204_s0  ;;  %p854_p2 = scmp.lt.s32.totalorder %s852_s8, %s847_s5 }
  0x15   : > { %p850_p13 = pnand %p849_p12, %p848_p11 }
  0x16   : > { %p855_p3 = por %p854_p2, %p853_p1 }
  0x17   : > { %p851_p0 = pneg %p850_p13 }
  0x19   : > { %p856_p4 = pnand %p855_p3, %p851_p0 }
  0x1b   : > { %859 = shalt.err (!%p856_p4)
}
  0x1c   : > { %s860_s11 = scalar_lea.vmem %s1047_s29, 64  ;;  %s971_s12 = smov [#allocation3]  }
  0x1d   : > { %p861_p5 = scmp.ne.s32.totalorder %s1047_s29, %s860_s11  ;;  %s865_s18 = sshll.u32 %s971_s12, 4  ;;  %s866_s18 = int_to_ptr.vmem [resolvable:$false] %s865_s18 }
  0x1e   : > { %s867_s19 = scalar_lea.vmem %s866_s18, 128  ;;  %p868_p13 = scmp.lt.s32.totalorder %s1047_s29, %s866_s18 }
  0x1f   : > { %p863_p6 = pnand %p861_p5, %p849_p12  ;;  %p869_p9 = scmp.lt.s32.totalorder %s867_s19, %s860_s11 }
  0x21   : > { %p864_p11 = pneg %p863_p6  ;;  %p870_p10 = por %p869_p9, %p868_p13 }
  0x23   : > { %p871_p1 = pnand %p870_p10, %p864_p11 }
  0x25   : > { %874 = shalt.err (!%p871_p1)
}
  0x26   : > { %744 = dma.hbm_to_vmem [thread:$0]  (!%p1049_p8), %s1045_s27, 64, %s1047_s29, %s136_s4  }
  0x27   : > { %p1211_p0 = scmp.lt.s32.totalorder %s969_s15, 4  ;;  %p1212_p2 = scmp.ge.s32.totalorder %s969_s15, 1 }
  0x28   : > { %s680_s24 = sshll.u32 %s1038_s22, 8  ;;  %s728_s25 = sshll.u32 %s969_s15, 12 }
  0x29   : > { %p1084_p3 = pnand %p1212_p2, %p1211_p0  ;;  %s1093_s5 = scalar_lea.hbm %s1205_s1, %s728_s25 }
  0x2a   : > { %s158_s6 = scalar_lea.vmem [#allocation6], %s680_s24  ;;  %s155_s27 = scalar_lea.sflag [#allocation7], %s1038_s22 }
  0x2b   : > { %s166_s7 = sshll.u32 %s158_s6, 4  ;;  %s875_s29 = scalar_lea.hbm %s1093_s5, 4096  ;;  %s1095_s7 = int_to_ptr.vmem [resolvable:$true] %s166_s7 }
  0x2c   : > { %p876_p9 = scmp.ne.s32.totalorder %s1093_s5, %s875_s29  ;;  %s880_s8 = scalar_lea.hbm %s1205_s1, 12288 }
  0x2d   : > { %p881_p5 = scmp.lt.s32.totalorder %s1093_s5, %s1205_s1  ;;  %p882_p6 = scmp.lt.s32.totalorder %s880_s8, %s875_s29 }
  0x2e   : > { %p878_p10 = pnand %p876_p9, %p849_p12 }
  0x2f   : > { %p883_p11 = por %p882_p6, %p881_p5 }
  0x30   : > { %p879_p4 = pneg %p878_p10 }
  0x32   : > { %p884_p13 = pnand %p883_p11, %p879_p4 }
  0x34   : > { %887 = shalt.err (!%p884_p13)
}
  0x35   : > { %s888_s11 = scalar_lea.vmem %s1095_s7, 4096  ;;  %s972_s12 = smov [#allocation6]  }
  0x36   : > { %p889_p1 = scmp.ne.s32.totalorder %s1095_s7, %s888_s11  ;;  %s893_s18 = sshll.u32 %s972_s12, 4  ;;  %s894_s18 = int_to_ptr.vmem [resolvable:$false] %s893_s18 }
  0x37   : > { %s895_s19 = scalar_lea.vmem %s894_s18, 8192  ;;  %p896_p9 = scmp.lt.s32.totalorder %s1095_s7, %s894_s18 }
  0x38   : > { %p891_p0 = pnand %p889_p1, %p849_p12  ;;  %p897_p10 = scmp.lt.s32.totalorder %s895_s19, %s888_s11 }
  0x3a   : > { %p892_p2 = pneg %p891_p0  ;;  %p898_p7 = por %p897_p10, %p896_p9 }
  0x3c   : > { %p899_p5 = pnand %p898_p7, %p892_p2 }
  0x3e   : > { %902 = shalt.err (!%p899_p5)
}
  0x3f   : > { %s973_s24 = smov 128   ;;  %s974_s25 = smov 8  }
  0x40   : > { %747 = dma.hbm_to_vmem [thread:$0]  (!%p1049_p8), %s1093_s5, 4096, %s1095_s7, %s155_s27, %s973_s24, %s973_s24, %s974_s25  }
  0x41   : > { %178 = sbr.rel (%p1084_p3) target bundleno = 764 (0x2fc), region = 32  ;;  %s180_s26 = sand.u32 (!%p1084_p3), 1, %s961_s13  }
  0x42   : > { %s685_s28 = sshll.u32 (!%p1084_p3), %s180_s26, 2  ;;  %s181_s6 = scalar_lea.sflag (!%p1084_p3), [#allocation4], %s180_s26 }
  0x43   : > { %s1125_s29 = scalar_lea.vmem (!%p1084_p3), [#allocation3], %s685_s28  ;;  %p1214_p7 = scmp.ne.s32.totalorder (!%p1084_p3), %s1209_s21, 0 }
  0x46   : > { %944 = dma.done.wait (%p1214_p7), %s181_s6, 64  }
  0x47   : > { %946 = vsyncadd (%p1214_p7), %s181_s6, 4294967232  ;;  %s686_s15 = sshll.u32 %s180_s26, 8  ;;  %s190_s30 = scalar_lea.sflag [#allocation7], %s180_s26 }
  0x48   : > { %s1131_s22 = scalar_lea.vmem [#allocation6], %s686_s15 }
  0x49   : > { %948 = dma.done.wait (%p1214_p7), %s190_s30, 4096  }
  0x4a   : > { %950 = vsyncadd (%p1214_p7), %s190_s30, 4294963200  ;;  %p687_p8 = scmp.ne.s32.totalorder %s1016_s16, 0 }
  0x4c   : > { %221 = sbr.rel (%p687_p8) target bundleno = 83 (0x53), region = 44 }
  0x51   : > { %v975_v0 = vmov 0.0  }
  0x52   : > { %222 = vst [vmem:[#allocation2] sm:$0x77] %v975_v0 }
  0x53 PF: > { %v787_v1 = vld [vmem:[%s1131_s22 + $0x74] ss:$8 sps:$4 sm:$0xff]   ;;  %v789_v2 = vld [vmem:[%s1131_s22 + $0x70] ss:$8 sps:$4 sm:$0xff]   ;;  %v790_v3 = vld [vmem:[%s1131_s22 + $0x64] ss:$8 sps:$4 sm:$0xff]  }
  0x54   : > { %428 = vmatprep.subr.bf16.mxu0 %v787_v1  ;;  %v792_v4 = vld [vmem:[%s1131_s22 + $0x60] ss:$8 sps:$4 sm:$0xff]   ;;  %v793_v5 = vld [vmem:[%s1131_s22 + $0x54] ss:$8 sps:$4 sm:$0xff]   ;;  %v795_v6 = vld [vmem:[%s1131_s22 + $0x50] ss:$8 sps:$4 sm:$0xff]  }
  0x55   : > { %429 = vmatpush1.bf16.msra.mxu0 %v789_v2  ;;  %v796_v7 = vld [vmem:[%s1131_s22 + $0x44] ss:$8 sps:$4 sm:$0xff]   ;;  %v798_v8 = vld [vmem:[%s1131_s22 + $0x40] ss:$8 sps:$4 sm:$0xff]   ;;  %v799_v9 = vld [vmem:[%s1131_s22 + $0x34] ss:$8 sps:$4 sm:$0xff]  }
  0x56   : > { %430 = vmatprep.subr.bf16.mxu0 %v790_v3  ;;  %v801_v10 = vld [vmem:[%s1131_s22 + $0x30] ss:$8 sps:$4 sm:$0xff]   ;;  %v802_v11 = vld [vmem:[%s1131_s22 + $0x24] ss:$8 sps:$4 sm:$0xff]   ;;  %v804_v12 = vld [vmem:[%s1131_s22 + $0x20] ss:$8 sps:$4 sm:$0xff]  }
  0x57   : > { %v805_v13 = vld [vmem:[%s1131_s22 + $0x14] ss:$8 sps:$4 sm:$0xff]   ;;  %v807_v16 = vld [vmem:[%s1131_s22 + $0x10] ss:$8 sps:$4 sm:$0xff]   ;;  %v808_v17 = vld [vmem:[%s1131_s22 + $0x4] ss:$8 sps:$4 sm:$0xff]  }
  0x58   : > { %v688_v14 = vld.sshfl [vmem:[%s1125_s29] sm:$0x33 pattern:$0x76325410]  ;;  %v810_v18 = vld [vmem:[%s1131_s22] ss:$8 sps:$4 sm:$0xff]  }
  0x59   : > { %431 = vmatpush1.bf16.msra.mxu0 %v792_v4  ;;  %v265_v15 = vcombine.high %v688_v14, %v688_v14  ;;  %v811_v19 = vld [vmem:[%s1131_s22 + $0xf4] ss:$8 sps:$4 sm:$0xff]   ;;  %v813_v20 = vld [vmem:[%s1131_s22 + $0xf0] ss:$8 sps:$4 sm:$0xff]   ;;  %v814_v21 = vld [vmem:[%s1131_s22 + $0xe4] ss:$8 sps:$4 sm:$0xff]  }
  0x5a   : > { %432 = vmatprep.subr.bf16.mxu0 %v793_v5  ;;  %v816_v22 = vld [vmem:[%s1131_s22 + $0xe0] ss:$8 sps:$4 sm:$0xff]   ;;  %v817_v23 = vld [vmem:[%s1131_s22 + $0xd4] ss:$8 sps:$4 sm:$0xff]   ;;  %v819_v24 = vld [vmem:[%s1131_s22 + $0xd0] ss:$8 sps:$4 sm:$0xff]  }
  0x5b   : > { %460 = vmatprep.mubr.bf16.mxu0 %v265_v15  ;;  %v820_v25 = vld [vmem:[%s1131_s22 + $0xc4] ss:$8 sps:$4 sm:$0xff]   ;;  %v822_v26 = vld [vmem:[%s1131_s22 + $0xc0] ss:$8 sps:$4 sm:$0xff]   ;;  %v823_v27 = vld [vmem:[%s1131_s22 + $0xb4] ss:$8 sps:$4 sm:$0xff]  }
  0x5c   : > { %v825_v28 = vld [vmem:[%s1131_s22 + $0xb0] ss:$8 sps:$4 sm:$0xff]   ;;  %v826_v29 = vld [vmem:[%s1131_s22 + $0xa4] ss:$8 sps:$4 sm:$0xff]   ;;  %v828_v30 = vld [vmem:[%s1131_s22 + $0xa0] ss:$8 sps:$4 sm:$0xff]  }
  0x5d   : > { %433 = vmatpush1.bf16.msra.mxu0 %v795_v6  ;;  %v829_v31 = vld [vmem:[%s1131_s22 + $0x94] ss:$8 sps:$4 sm:$0xff]   ;;  %v831_v32 = vld [vmem:[%s1131_s22 + $0x90] ss:$8 sps:$4 sm:$0xff]   ;;  %v832_v33 = vld [vmem:[%s1131_s22 + $0x84] ss:$8 sps:$4 sm:$0xff]  }
  0x5e   : > { %434 = vmatprep.subr.bf16.mxu0 %v796_v7  ;;  %v834_v34 = vld [vmem:[%s1131_s22 + $0x80] ss:$8 sps:$4 sm:$0xff]   ;;  %v223_v36 = vld [vmem:[#allocation2] sm:$0x77]  ;;  %p721_p12 = scmp.ne.s32.totalorder %s1016_s16, 2 }
  0x61   : > { %435 = vmatpush1.bf16.msra.mxu0 %v798_v8 }
  0x62   : > { %436 = vmatprep.subr.bf16.mxu0 %v799_v9 }
  0x65   : > { %437 = vmatpush1.bf16.msra.mxu0 %v801_v10 }
  0x66   : > { %438 = vmatprep.subr.bf16.mxu0 %v802_v11 }
  0x69   : > { %439 = vmatpush1.bf16.msra.mxu0 %v804_v12 }
  0x6a   : > { %440 = vmatprep.subr.bf16.mxu0 %v805_v13 }
  0x6d   : > { %441 = vmatpush1.bf16.msra.mxu0 %v807_v16 }
  0x6e   : > { %442 = vmatprep.subr.bf16.mxu0 %v808_v17 }
  0x71   : > { %443 = vmatpush1.bf16.msra.mxu0 %v810_v18 }
  0x72   : > { %444 = vmatprep.subr.bf16.mxu0 %v811_v19 }
  0x75   : > { %445 = vmatpush2.bf16.msra.mxu0 %v813_v20 }
  0x76   : > { %446 = vmatprep.subr.bf16.mxu0 %v814_v21 }
  0x79   : > { %447 = vmatpush2.bf16.msra.mxu0 %v816_v22 }
  0x7a   : > { %448 = vmatprep.subr.bf16.mxu0 %v817_v23 }
  0x7d   : > { %449 = vmatpush2.bf16.msra.mxu0 %v819_v24 }
  0x7e   : > { %450 = vmatprep.subr.bf16.mxu0 %v820_v25 }
  0x81   : > { %451 = vmatpush2.bf16.msra.mxu0 %v822_v26 }
  0x82   : > { %452 = vmatprep.subr.bf16.mxu0 %v823_v27 }
  0x85   : > { %453 = vmatpush2.bf16.msra.mxu0 %v825_v28 }
  0x86   : > { %454 = vmatprep.subr.bf16.mxu0 %v826_v29 }
  0x89   : > { %455 = vmatpush2.bf16.msra.mxu0 %v828_v30 }
  0x8a   : > { %456 = vmatprep.subr.bf16.mxu0 %v829_v31 }
  0x8d   : > { %457 = vmatpush2.bf16.msra.mxu0 %v831_v32 }
  0x8e   : > { %458 = vmatprep.subr.bf16.mxu0 %v832_v33 }
  0x91   : > { %459 = vmatpush2.bf16.msra.mxu0 %v834_v34 }
  0x94   : > { %461 = vmatmul.mubr.bf16.vlgmr.msra.gmra.mxu0 %v688_v14 }
 0x154   : > { %v462_v35 = vpop.f32.mrf.mxu0 }
 0x156   : > { %v464_v37 = vpop.f32.mrf.mxu0 }
 0x157   : > { %v471_v38 = vcombine.low %v462_v35, %v464_v37  ;;  %478 = sbr.rel (%p721_p12) target bundleno = 749 (0x2ed), region = 48 }
 0x158   : > { %v466_v39 = vpop.f32.mrf.mxu0 }
 0x159   : > { %v473_v40 = vadd.f32 %v471_v38, %v223_v36 }
 0x15a   : > { %v467_v41 = vpop.f32.mrf.mxu0 }
 0x15b   : > { %474 = vst [vmem:[#allocation2] sm:$0x77] %v473_v40 }
 0x15c   : > { %v480_v42 = vld [vmem:[%s1206_s2] sm:$0x1]  ;;  %v481_v43 = vlaneseq  ;;  %vm552_vm0 = vcmask 1040384   ;;  %vm494_vm1 = vcmask 1042434   ;;  %vm486_vm2 = vcmask 1041408  }
 0x15d   : > { %v551_v45 = vmul.f32 %v480_v42, %v480_v42  ;;  %vm521_vm11 = vcmask 1024  }
 0x15e   : > { %v482_v48 = vshrl.u32 %v481_v43, 7 }
 0x15f   : > { %v553_v49 = vsel %vm552_vm0, %v551_v45, 0.0 }
 0x160   : > { %v537_v52 = vsub.s32 0, %v482_v48  ;;  %554 = vadd.xlane.f32.xlu1 %v553_v49  ;;  %v483_v53 = vsub.s32 2, %v482_v48 }
 0x162   : > { %v479_v44 = vld [vmem:[#allocation2] sm:$0x77]  ;;  %v538_v56 = vrot.slane %v480_v42, %v537_v52 }
 0x163   : > { %v490_v46 = vmul.f32 %v479_v44, %v479_v44  ;;  %v541_v47 = vrot.slane %v479_v44, 4  ;;  %v484_v57 = vrot.slane %v479_v44, %v483_v53 }
 0x165   : > { %v495_v50 = vsel %vm494_vm1, %v490_v46, 0.0  ;;  %v547_v51 = vmul.f32 %v541_v47, %v541_v47  ;;  %v491_v55 = vsel %vm486_vm2, %v490_v46, 0.0  ;;  %v543_v58 = vmul.f32 %v541_v47, %v538_v56 }
 0x166   : > { %496 = vadd.xlane.f32.xlu0 %v495_v50  ;;  %v485_v59 = vmul.f32 %v484_v57, %v479_v44 }
 0x167   : > { %v548_v54 = vsel %vm486_vm2, %v547_v51, 0.0  ;;  %v544_v60 = vsel %vm486_vm2, %v543_v58, 0.0 }
 0x168   : > { %549 = vadd.xlane.f32.xlu1 %v548_v54  ;;  %v487_v61 = vsel %vm486_vm2, %v485_v59, 0.0 }
 0x16a   : > { %492 = vadd.xlane.f32.xlu0 %v491_v55 }
 0x16c   : > { %545 = vadd.xlane.f32.xlu1 %v544_v60 }
 0x16e   : > { %488 = vadd.xlane.f32.xlu0 %v487_v61 }
 0x1e9   : > { %v555_v62 = vpop.xlane.xlu1 %554 }
 0x1ea   : > { %835 = vrsqrt.f32 %v555_v62  ;;  %vm565_vm3 = vcmp.eq.f32.partialorder %v555_v62, inf  ;;  %v568_v5 = vand.u32 2147483648, %v555_v62  ;;  %vm567_vm4 = vcmp.eq.f32.partialorder %v555_v62, 0.0 }
 0x1ef   : > { %v497_v63 = vpop.xlane.xlu0 %496 }
 0x1f0   : > { %837 = vrsqrt.f32 %v497_v63  ;;  %vm507_vm5 = vcmp.eq.f32.partialorder %v497_v63, inf  ;;  %v510_v8 = vand.u32 2147483648, %v497_v63  ;;  %vm509_vm6 = vcmp.eq.f32.partialorder %v497_v63, 0.0 }
 0x1f1   : > { %v550_v0 = vpop.xlane.xlu1 %549 }
 0x1f2   : > { %839 = vrsqrt.f32 %v550_v0  ;;  %vm558_vm7 = vcmp.eq.f32.partialorder %v550_v0, inf  ;;  %vm560_vm8 = vcmp.eq.f32.partialorder %v550_v0, 0.0  ;;  %v561_v15 = vand.u32 2147483648, %v550_v0 }
 0x1f3   : > { %v493_v1 = vpop.xlane.xlu0 %492 }
 0x1f4   : > { %841 = vrsqrt.f32 %v493_v1  ;;  %vm500_vm9 = vcmp.eq.f32.partialorder %v493_v1, inf  ;;  %v503_v19 = vand.u32 2147483648, %v493_v1  ;;  %vm502_vm10 = vcmp.eq.f32.partialorder %v493_v1, 0.0 }
 0x1f5   : > { %v546_v28 = vpop.xlane.xlu1 %545 }
 0x1f7   : > { %v836_v2 = vpop.eup %835  ;;  %v489_v29 = vpop.xlane.xlu0 %488 }
 0x1f8   : > { %v564_v4 = vmul.f32 %v836_v2, %v555_v62 }
 0x1fa   : > { %v566_v7 = vsel %vm565_vm3, %v555_v62, %v564_v4 }
 0x1fb   : > { %v569_v10 = vsel %vm567_vm4, %v568_v5, %v566_v7 }
 0x1fc   : > { %v573_v17 = vrot.slane %v569_v10, %v537_v52 }
 0x1fd   : > { %v838_v3 = vpop.eup %837 }
 0x1fe   : > { %v506_v6 = vmul.f32 %v838_v3, %v497_v63 }
 0x1ff   : > { %v840_v9 = vpop.eup %839 }
 0x200   : > { %v508_v11 = vsel %vm507_vm5, %v497_v63, %v506_v6  ;;  %v557_v14 = vmul.f32 %v840_v9, %v550_v0 }
 0x201   : > { %v842_v12 = vpop.eup %841  ;;  %v511_v13 = vsel %vm509_vm6, %v510_v8, %v508_v11 }
 0x202   : > { %v499_v16 = vmul.f32 %v842_v12, %v493_v1  ;;  %v559_v18 = vsel %vm558_vm7, %v550_v0, %v557_v14  ;;  %v515_v20 = vrot.slane %v511_v13, %v483_v53 }
 0x203   : > { %v562_v21 = vsel %vm560_vm8, %v561_v15, %v559_v18 }
 0x204   : > { %v501_v22 = vsel %vm500_vm9, %v493_v1, %v499_v16  ;;  %v574_v23 = vmul.f32 %v573_v17, %v562_v21 }
 0x205   : > { %v504_v24 = vsel %vm502_vm10, %v503_v19, %v501_v22 }
 0x206   : > { %v516_v25 = vmul.f32 %v515_v20, %v504_v24  ;;  %v575_v26 = vadd.f32 1e-08, %v574_v23 }
 0x208   : > { %v517_v27 = vadd.f32 1e-08, %v516_v25  ;;  %843 = vrcp.f32 %v575_v26 }
 0x20a   : > { %845 = vrcp.f32 %v517_v27 }
 0x215   : > { %v844_v30 = vpop.eup %843 }
 0x216   : > { %v577_v32 = vmul.f32 %v844_v30, %v546_v28 }
 0x217   : > { %v846_v31 = vpop.eup %845 }
 0x218   : > { %v519_v33 = vmul.f32 %v846_v31, %v489_v29  ;;  %v578_v34 = vsub.f32 1.0, %v577_v32 }
 0x21a   : > { %v520_v35 = vsub.f32 1.0, %v519_v33  ;;  %v579_v36 = vsel %vm521_vm11, %v578_v34, 0.0 }
 0x21b   : > { %580 = vadd.xlane.f32.xlu1 %v579_v36 }
 0x21c   : > { %v522_v37 = vsel %vm521_vm11, %v520_v35, 0.0 }
 0x21d   : > { %523 = vadd.xlane.f32.xlu0 %v522_v37 }
 0x2a4   : > { %v581_v38 = vpop.xlane.xlu1 %580 }
 0x2a5   : > { %v582_v39 = vrot.slane %v581_v38, 4 }
 0x2a6   : > { %v524_v40 = vpop.xlane.xlu0 %523 }
 0x2a7   : > { %v525_v41 = vrot.slane %v524_v40, 4  ;;  %v583_v42 = vadd.f32 %v582_v39, %v581_v38 }
 0x2a9   : > { %v526_v43 = vadd.f32 %v525_v41, %v524_v40  ;;  %v584_v44 = vrot.slane %v583_v42, 2 }
 0x2ab   : > { %v527_v45 = vrot.slane %v526_v43, 2  ;;  %v585_v46 = vadd.f32 %v584_v44, %v583_v42 }
 0x2ad   : > { %v528_v47 = vadd.f32 %v527_v45, %v526_v43  ;;  %v586_v48 = vrot.slane %v585_v46, 1 }
 0x2af   : > { %v529_v49 = vrot.slane %v528_v47, 1  ;;  %v587_v50 = vadd.f32 %v586_v48, %v585_v46 }
 0x2b1   : > { %v530_v51 = vadd.f32 %v529_v49, %v528_v47 }
 0x2b3   : > { %729 = vpush %v530_v51 }
 0x2b4   : > { %731 = vpush %v587_v50 }
 0x2e4   : > { %s730_s5 = spop %729 }
 0x2e5   : > { %v532_v52 = vstv %s730_s5  ;;  %s732_s7 = spop %731 }
 0x2e6   : > { %v533_v53 = vmul.f32 0.5, %v532_v52  ;;  %v589_v54 = vstv %s732_s7 }
 0x2e7   : > { %v590_v56 = vmul.f32 0.5, %v589_v54 }
 0x2e8   : > { %v591_v55 = vmul.f32 0.1, %v533_v53 }
 0x2ea   : > { %v592_v57 = vadd.f32 %v591_v55, %v590_v56 }
 0x2ec   : > { %593 = vst [vmem:[#allocation8] sm:$0x1] %v592_v57 }
 0x2ed PF: > { %p749_p3 = scmp.eq.s32.totalorder %s1016_s16, 2  ;;  %s976_s27 = smov [#allocation8]  }
 0x2ee   : > { %s601_s4 = sshll.u32 %s976_s27, 4  ;;  %s602_s4 = int_to_ptr.vmem [resolvable:$true] %s601_s4 }
 0x2ef   : > { %s903_s8 = scalar_lea.vmem %s602_s4, 16  ;;  %s909_s9 = scalar_lea.vmem %s602_s4, 32 }
 0x2f0   : > { %p904_p4 = scmp.ne.s32.totalorder %s602_s4, %s903_s8  ;;  %p910_p13 = scmp.lt.s32.totalorder %s602_s4, %s602_s4 }
 0x2f1   : > { %p911_p1 = scmp.lt.s32.totalorder %s909_s9, %s903_s8 }
 0x2f2   : > { %p905_p6 = pnand %p904_p4, %p749_p3 }
 0x2f3   : > { %p912_p0 = por %p911_p1, %p910_p13 }
 0x2f4   : > { %p906_p11 = pneg %p905_p6 }
 0x2f6   : > { %p913_p2 = pnand %p912_p0, %p906_p11 }
 0x2f8   : > { %916 = shalt.err (!%p913_p2)
}
 0x2f9   : > { %738 = dma.vmem_to_hbm [thread:$0]  (%p749_p3), %s602_s4, 16, %s1207_s3, [#allocation5]  }
 0x2fa   : > { %952 = dma.done.wait (%p749_p3), [#allocation5], 16  }
 0x2fb   : > { %954 = vsyncadd (%p749_p3), [#allocation5], 4294967280 }
 0x2fc PF: > { %p17_p9 = scmp.ge.s32.totalorder %s1019_s17, 5   ;;  %s1215_s12 = smov %s961_s13 }
 0x2fd   : > { %s1216_s13 = smov %s965_s14  ;;  %s1217_s14 = smov %s1029_s20 }
 0x2fe   : > { %s1218_s15 = smov %s1019_s17  ;;  %19 = sbr.rel (!%p17_p9) target bundleno = 6 (0x6), region = 90 }
 0x303   :  { %614 = vsyncpa [#allocation4], 1 }
 0x304   :  { %616 = vsyncpa [#allocation4 + $0x1], 1 }
 0x305   :  { %617 = vsyncpa [#allocation7], 1 }
 0x306   :  { %619 = vsyncpa [#allocation7 + $0x1], 1 }
 0x307   :  { %620 = vsyncpa [#allocation5], 1 }
 0x308   :  { %622 = vsyncpa [#allocation5 + $0x1], 1 }

</bundles_post_ra>
